<compile_context>
chip_gen: v6e
topology: v6e:2x2x1
jax: 0.10.0
libtpu: 0.0.40
codegen_flags: <defaults>
</compile_context>

<pallas_src>
import jax
import jax.numpy as jnp
from jax.experimental import pallas as pl
from jax.experimental.pallas import tpu as pltpu

_NEG = -1e30                        # finite stand-in for -inf (NaN-safe through MXU)
_VMEM_LIMIT = 48 * 1024 * 1024      # <= ~48 MiB: headroom on v7x (64M), fine on v5e/v6e


def _round_up(x, m):
    return (x + m - 1) // m * m


def _fit_tile(pref, dim, unit=128):
    """Largest multiple of `unit` <= min(pref, dim) that divides `dim` (dim % unit == 0)."""
    t = max(unit, (min(pref, dim) // unit) * unit)
    while dim % t != 0:
        t -= unit
    return t


def _maybe_split_for_megacore(Mp, Np, tm, tn):
    """v7x: ensure >=2 blocks along a parallel axis so both TensorCores get work."""
    if Mp // tm == 1 and Np // tn == 1:
        if tm >= 32 and tm % 32 == 0:
            tm //= 2
        elif tn >= 256 and tn % 256 == 0:
            tn //= 2
    return tm, tn


def _pad2_bf16(x, rp, cp):
    """Pad a 2-D activation to (rp, cp) bf16; skip the copy when already aligned."""
    r, c = x.shape
    xb = x.astype(jnp.bfloat16)
    if (r, c) == (rp, cp):
        return xb
    return jnp.zeros((rp, cp), jnp.bfloat16).at[:r, :c].set(xb)


# --------------------------------------------------------------------------- #
# Tiled matmul kernel: C = A @ B  (bf16 operands, f32 accumulator, bf16 output)
# --------------------------------------------------------------------------- #
def _matmul_kernel(a_ref, b_ref, o_ref, acc_ref):
    @pl.when(pl.program_id(2) == 0)
    def _():
        acc_ref[...] = jnp.zeros_like(acc_ref)

    acc_ref[...] += jnp.dot(a_ref[...], b_ref[...],
                            preferred_element_type=jnp.float32)

    @pl.when(pl.program_id(2) == pl.num_programs(2) - 1)
    def _():
        o_ref[...] = acc_ref[...].astype(o_ref.dtype)


def pallas_matmul(a, b_p, n_out, *, tm=256, tn=256, tk=256):
    """a: [M, K] float activations; b_p: pre-padded bf16 [Kp, Np]; returns bf16 [M, n_out]."""
    M, K = a.shape
    Kp, Np = b_p.shape
    assert Kp % 128 == 0 and Np % 128 == 0 and K <= Kp and n_out <= Np

    Mp = _round_up(M, 16)                       # bf16 sublane packing
    tm = min(tm, Mp)
    Mp = _round_up(Mp, tm)
    tk = _fit_tile(tk, Kp)
    tn = _fit_tile(tn, Np)
    tm, tn = _maybe_split_for_megacore(Mp, Np, tm, tn)

    a_p = _pad2_bf16(a, Mp, Kp)

    out = pl.pallas_call(
        _matmul_kernel,
        out_shape=jax.ShapeDtypeStruct((Mp, Np), jnp.bfloat16),
        grid_spec=pltpu.PrefetchScalarGridSpec(
            num_scalar_prefetch=0,
            grid=(Mp // tm, Np // tn, Kp // tk),
            in_specs=[pl.BlockSpec((tm, tk), lambda i, j, k: (i, k)),
                      pl.BlockSpec((tk, tn), lambda i, j, k: (k, j))],
            out_specs=pl.BlockSpec((tm, tn), lambda i, j, k: (i, j)),
            scratch_shapes=[pltpu.VMEM((tm, tn), jnp.float32)]),
        compiler_params=pltpu.CompilerParams(
            dimension_semantics=("parallel", "parallel", "arbitrary"),
            vmem_limit_bytes=_VMEM_LIMIT),
    )(a_p, b_p)
    return out[:M, :n_out]


# --------------------------------------------------------------------------- #
# Fused projection kernel: tanh(A @ W + b)   (bias + activation on last K step)
# --------------------------------------------------------------------------- #
def _proj_kernel(a_ref, w_ref, b_ref, o_ref, acc_ref):
    @pl.when(pl.program_id(2) == 0)
    def _():
        acc_ref[...] = jnp.zeros_like(acc_ref)

    acc_ref[...] += jnp.dot(a_ref[...], w_ref[...],
                            preferred_element_type=jnp.float32)

    @pl.when(pl.program_id(2) == pl.num_programs(2) - 1)
    def _():
        o_ref[...] = jnp.tanh(acc_ref[...] + b_ref[...]).astype(o_ref.dtype)


def pallas_proj_tanh(a, w_p, b_p, n_out, *, tm=256, tn=256, tk=256):
    """a: [M, K]; w_p: pre-padded bf16 [Kp, Np]; b_p: pre-padded f32 [1, Np]."""
    M, K = a.shape
    Kp, Np = w_p.shape
    assert Kp % 128 == 0 and Np % 128 == 0 and K <= Kp and n_out <= Np

    Mp = _round_up(M, 16)
    tm = min(tm, Mp)
    Mp = _round_up(Mp, tm)
    tk = _fit_tile(tk, Kp)
    tn = _fit_tile(tn, Np)
    tm, tn = _maybe_split_for_megacore(Mp, Np, tm, tn)

    a_p = _pad2_bf16(a, Mp, Kp)

    out = pl.pallas_call(
        _proj_kernel,
        out_shape=jax.ShapeDtypeStruct((Mp, Np), jnp.bfloat16),
        grid_spec=pltpu.PrefetchScalarGridSpec(
            num_scalar_prefetch=0,
            grid=(Mp // tm, Np // tn, Kp // tk),
            in_specs=[pl.BlockSpec((tm, tk), lambda i, j, k: (i, k)),
                      pl.BlockSpec((tk, tn), lambda i, j, k: (k, j)),
                      pl.BlockSpec((1, tn), lambda i, j, k: (0, j))],
            out_specs=pl.BlockSpec((tm, tn), lambda i, j, k: (i, j)),
            scratch_shapes=[pltpu.VMEM((tm, tn), jnp.float32)]),
        compiler_params=pltpu.CompilerParams(
            dimension_semantics=("parallel", "parallel", "arbitrary"),
            vmem_limit_bytes=_VMEM_LIMIT),
    )(a_p, w_p, b_p)
    return out[:M, :n_out]


# --------------------------------------------------------------------------- #
# Fused: max-pool-over-time (masks already folded upstream) + classifier linear
#   grid = (batch blocks "parallel", seq blocks "arbitrary")
#   running-max f32 accumulators in VMEM, two bf16 classifier dots on last step
# --------------------------------------------------------------------------- #
def _pool_classify_kernel(mem_ref, ctx_ref, we_ref, wc_ref, o_ref, enc_acc, ctx_acc):
    s = pl.program_id(1)

    @pl.when(s == 0)
    def _():
        enc_acc[...] = jnp.full_like(enc_acc, _NEG)
        ctx_acc[...] = jnp.full_like(ctx_acc, _NEG)

    enc_acc[...] = jnp.maximum(enc_acc[...],
                               jnp.max(mem_ref[...].astype(jnp.float32), axis=1))
    ctx_acc[...] = jnp.maximum(ctx_acc[...],
                               jnp.max(ctx_ref[...].astype(jnp.float32), axis=1))

    @pl.when(s == pl.num_programs(1) - 1)
    def _():
        o_ref[...] = (jnp.dot(enc_acc[...].astype(jnp.bfloat16), we_ref[...],
                              preferred_element_type=jnp.float32)
                      + jnp.dot(ctx_acc[...].astype(jnp.bfloat16), wc_ref[...],
                                preferred_element_type=jnp.float32))


def hss_mask_and_classify(mem, src_mask, ctx, trg_mask, w_cls_enc_p, w_cls_ctx_p,
                          b_cls, num_classes, *, tb=8, ts=256):
    B, Ss, M = mem.shape
    St = ctx.shape[1]
    Mp, Cp = w_cls_enc_p.shape

    # fold masks into the data upstream (finite -inf stand-in) -> no mask blocks
    mem_m = jnp.where(src_mask[:, :, None] > 0,
                      mem, jnp.asarray(_NEG, mem.dtype)).astype(jnp.bfloat16)
    ctx_m = jnp.where(trg_mask[:, :, None] > 0,
                      ctx, jnp.asarray(_NEG, ctx.dtype)).astype(jnp.bfloat16)

    Bp = _round_up(B, tb)
    if Bp // tb < 2:
        Bp = 2 * tb                        # v7x: >=2 batch blocks on "parallel" axis
    Sp = _round_up(max(Ss, St), 16)
    ts = min(ts, Sp)
    Sp = _round_up(Sp, ts)

    mem_p = jnp.full((Bp, Sp, Mp), _NEG, jnp.bfloat16).at[:B, :Ss, :M].set(mem_m)
    ctx_p = jnp.full((Bp, Sp, Mp), _NEG, jnp.bfloat16).at[:B, :St, :M].set(ctx_m)

    logit_p = pl.pallas_call(
        _pool_classify_kernel,
        out_shape=jax.ShapeDtypeStruct((Bp, Cp), jnp.float32),
        grid_spec=pltpu.PrefetchScalarGridSpec(
            num_scalar_prefetch=0,
            grid=(Bp // tb, Sp // ts),
            in_specs=[pl.BlockSpec((tb, ts, Mp), lambda b, s: (b, s, 0)),
                      pl.BlockSpec((tb, ts, Mp), lambda b, s: (b, s, 0)),
                      pl.BlockSpec((Mp, Cp), lambda b, s: (0, 0)),
                      pl.BlockSpec((Mp, Cp), lambda b, s: (0, 0))],
            out_specs=pl.BlockSpec((tb, Cp), lambda b, s: (b, 0)),
            scratch_shapes=[pltpu.VMEM((tb, Mp), jnp.float32),
                            pltpu.VMEM((tb, Mp), jnp.float32)]),
        compiler_params=pltpu.CompilerParams(
            dimension_semantics=("parallel", "arbitrary"),
            vmem_limit_bytes=_VMEM_LIMIT),
    )(mem_p, ctx_p, w_cls_enc_p, w_cls_ctx_p)

    # classifier bias added outside the kernel (avoids a padded 1xC VMEM block)
    return logit_p[:B, :num_classes] + b_cls[None, :]


# --------------------------------------------------------------------------- #
# Parameters: logical f32 params + one-time lane-padded bf16 device weights
# --------------------------------------------------------------------------- #
def init_params(key, vocab_size, emb_size, memory_bank_size, num_classes):
    ks = jax.random.split(key, 6)
    s = 0.1
    return {
        "embedding": jax.random.normal(ks[0], (vocab_size, emb_size), jnp.float32) * s,
        "w_enc": jax.random.normal(ks[1], (emb_size, memory_bank_size), jnp.float32) * s,
        "b_enc": jnp.zeros((memory_bank_size,), jnp.float32),
        "w_dec": jax.random.normal(ks[2], (emb_size, memory_bank_size), jnp.float32) * s,
        "b_dec": jnp.zeros((memory_bank_size,), jnp.float32),
        "w_vocab": jax.random.normal(ks[3], (memory_bank_size, vocab_size), jnp.float32) * s,
        "w_cls": jax.random.normal(ks[4], (2 * memory_bank_size, num_classes), jnp.float32) * s,
        "b_cls": jnp.zeros((num_classes,), jnp.float32),
    }


def prepare_params(params):
    """Pad + cast static weights to lane-aligned bf16 ONCE (hoisted out of forward)."""
    E, M = params["w_enc"].shape
    V = params["w_vocab"].shape[1]
    C = params["w_cls"].shape[1]
    Ep, Mp, Vp, Cp = (_round_up(x, 128) for x in (E, M, V, C))

    def pad_w(w, rp, cp):
        return (jnp.zeros((rp, cp), jnp.bfloat16)
                .at[:w.shape[0], :w.shape[1]].set(w.astype(jnp.bfloat16)))

    def pad_b(b, cp):
        return jnp.zeros((1, cp), jnp.float32).at[0, :b.shape[0]].set(b.astype(jnp.float32))

    prep = {
        "embedding": params["embedding"].astype(jnp.float32),
        "w_enc_p": pad_w(params["w_enc"], Ep, Mp),
        "b_enc_p": pad_b(params["b_enc"], Mp),
        "w_dec_p": pad_w(params["w_dec"], Ep, Mp),
        "b_dec_p": pad_b(params["b_dec"], Mp),
        "w_vocab_p": pad_w(params["w_vocab"], Mp, Vp),
        "w_cls_enc_p": pad_w(params["w_cls"][:M], Mp, Cp),   # enc-feature rows
        "w_cls_ctx_p": pad_w(params["w_cls"][M:], Mp, Cp),   # ctx-feature rows
        "b_cls": params["b_cls"].astype(jnp.float32),
    }
    dims = {"E": E, "M": M, "V": V, "C": C}
    return prep, dims


# --------------------------------------------------------------------------- #
# HSSModel.forward
# --------------------------------------------------------------------------- #
def hss_forward(prep, dims, src, src_lens, trg, src_oov, max_num_oov, src_mask,
                trg_mask, rating, src_sent_positions, src_sent_nums, src_sent_mask):
    B, Ss = src.shape
    St = trg.shape[1]
    E, M, V = dims["E"], dims["M"], dims["V"]
    emb = prep["embedding"]

    # TODO(synk): HSSSeq2SeqModel (BiGRU encoder + attentional copy decoder) is not
    # provided; a deterministic linear/attention stand-in reproduces its output shapes.
    src_emb = emb[src]                                              # [B, Ss, E] f32
    trg_emb = emb[trg]                                              # [B, St, E] f32

    # encoder / decoder projections: two separate Pallas calls (no discarded
    # cross-terms), bf16 outputs, bias + tanh fused in-kernel on the last K step.
    encoder_memory_bank = pallas_proj_tanh(
        src_emb.reshape(B * Ss, E), prep["w_enc_p"], prep["b_enc_p"], M
    ).reshape(B, Ss, M)                                             # bf16
    dec_states = pallas_proj_tanh(
        trg_emb.reshape(B * St, E), prep["w_dec_p"], prep["b_dec_p"], M
    ).reshape(B, St, M)                                             # bf16

    mask_f = src_mask.astype(jnp.float32)
    denom = jnp.maximum(jnp.sum(mask_f, axis=1, keepdims=True), 1.0)
    encoder_final_state = jnp.sum(
        encoder_memory_bank.astype(jnp.float32) * mask_f[:, :, None], axis=1) / denom

    # last *valid* decoder state per target length
    last_idx = jnp.maximum(jnp.sum(trg_mask, axis=1).astype(jnp.int32) - 1, 0)
    h_t = dec_states[jnp.arange(B), last_idx].astype(jnp.float32)   # [B, M]

    # attention over source positions (small batched matmuls; left to XLA fusion)
    # TODO(synk): at production Ss/St fuse this into a flash-style Pallas kernel
    # emitting sentiment_context in bf16 instead of materializing [B,St,Ss] scores.
    scores = jnp.einsum("btm,bsm->bts", dec_states, encoder_memory_bank,
                        preferred_element_type=jnp.float32)
    scores = jnp.where(src_mask[:, None, :] > 0, scores, _NEG)
    seq2seq_attention_dist = jax.nn.softmax(scores, axis=-1)        # [B, St, Ss] f32
    sentiment_context = jnp.einsum("bts,bsm->btm",
                                   seq2seq_attention_dist.astype(jnp.bfloat16),
                                   encoder_memory_bank,
                                   preferred_element_type=jnp.float32)

    vocab_logits = pallas_matmul(dec_states.reshape(B * St, M),
                                 prep["w_vocab_p"], V)              # bf16 [B*St, V]
    vocab_logits = vocab_logits.reshape(B, St, V).astype(jnp.float32)
    oov_pad = jnp.full((B, St, max_num_oov), _NEG, jnp.float32)
    decoder_dist = jax.nn.softmax(
        jnp.concatenate([vocab_logits, oov_pad], axis=-1), axis=-1)  # [B, St, V+oov]

    coverage = None

    # ---- HSSModel.forward visible compute: masking + max-pool + classifier ----
    logit = hss_mask_and_classify(encoder_memory_bank, src_mask, sentiment_context,
                                  trg_mask, prep["w_cls_enc_p"], prep["w_cls_ctx_p"],
                                  prep["b_cls"], dims["C"])
    # TODO(synk): HSSClassifier dropout / `ordinal` head omitted (inference, raw logits).
    classifier_attention_dist = None

    return (decoder_dist, h_t, seq2seq_attention_dist, encoder_final_state, coverage,
            logit, classifier_attention_dist)


# --------------------------------------------------------------------------- #
if __name__ == "__main__":
    key = jax.random.PRNGKey(0)
    B, Ss, St = 2, 16, 8
    vocab_size, emb_size, encoder_size, num_classes = 50, 32, 32, 5
    memory_bank_size = 2 * encoder_size          # opt.bidirectional = True
    max_num_oov = 4

    k_param, k_src, k_trg = jax.random.split(key, 3)
    params = init_params(k_param, vocab_size, emb_size, memory_bank_size, num_classes)
    prep, dims = prepare_params(params)          # one-time weight padding/cast

    src = jax.random.randint(k_src, (B, Ss), 0, vocab_size)
    trg = jax.random.randint(k_trg, (B, St), 0, vocab_size)
    src_oov = src
    src_lens = jnp.array([Ss, Ss - 4], jnp.int32)
    trg_lens = jnp.array([St, St - 2], jnp.int32)
    src_mask = (jnp.arange(Ss)[None, :] < src_lens[:, None]).astype(jnp.float32)
    trg_mask = (jnp.arange(St)[None, :] < trg_lens[:, None]).astype(jnp.float32)
    rating = jnp.array([3, 1], jnp.int32)
    src_sent_positions = jnp.zeros((B, 4), jnp.int32)
    src_sent_nums = jnp.array([2, 2], jnp.int32)
    src_sent_mask = jnp.ones((B, 4), jnp.float32)

    outs = hss_forward(prep, dims, src, src_lens, trg, src_oov, max_num_oov, src_mask,
                       trg_mask, rating, src_sent_positions, src_sent_nums,
                       src_sent_mask)

    for o in outs:
        if o is not None:
            jax.block_until_ready(o)

    decoder_dist, h_t, attn, enc_final, coverage, logit, cls_attn = outs
    assert decoder_dist.shape == (B, St, vocab_size + max_num_oov)
    assert h_t.shape == (B, memory_bank_size)
    assert attn.shape == (B, St, Ss)
    assert enc_final.shape == (B, memory_bank_size)
    assert logit.shape == (B, num_classes)
    assert bool(jnp.all(jnp.isfinite(logit)))
    assert bool(jnp.all(jnp.isfinite(decoder_dist)))
    print("KERNEL_OK")
</pallas_src>

<mosaic_0001>
module attributes {stable_mosaic.version = 11 : i64} {
  func.func @_proj_kernel(%arg0: i32, %arg1: i32, %arg2: i32, %arg3: memref<16x128xbf16, #tpu.memory_space<vmem>>, %arg4: memref<128x128xbf16, #tpu.memory_space<vmem>>, %arg5: memref<1x128xf32, #tpu.memory_space<vmem>>, %arg6: memref<16x128xbf16, #tpu.memory_space<vmem>>, %arg7: memref<16x128xf32, #tpu.memory_space<vmem>>) attributes {dimension_semantics = [#tpu.dimension_semantics<parallel>, #tpu.dimension_semantics<parallel>, #tpu.dimension_semantics<arbitrary>], iteration_bounds = array<i64: 2, 1, 1>, scalar_prefetch = 0 : i64, scratch_operands = 1 : i64, tpu.core_type = #tpu.core_type<tc>, window_params = [{transform_indices = @transform_0, window_bounds = array<i64: 16, 128>}, {transform_indices = @transform_1, window_bounds = array<i64: 128, 128>}, {transform_indices = @transform_2, window_bounds = array<i64: 1, 128>}, {transform_indices = @transform_3, window_bounds = array<i64: 16, 128>}]} {
    %c0_i32 = arith.constant 0 : i32
    %0 = arith.cmpi eq, %arg2, %c0_i32 : i32
    %1 = arith.extui %0 : i1 to i32
    %c0_i32_0 = arith.constant 0 : i32
    %2 = arith.cmpi ne, %1, %c0_i32_0 : i32
    scf.if %2 {
      %cst_10 = arith.constant 0.000000e+00 : f32
      %12 = vector.broadcast %cst_10 : f32 to vector<16x128xf32>
      %c0_11 = arith.constant 0 : index
      %c0_12 = arith.constant 0 : index
      %13 = vector.load %arg7[%c0_11, %c0_12] : memref<16x128xf32, #tpu.memory_space<vmem>>, vector<16x128xf32>
      tpu.vector_store %arg7[%c0_11, %c0_12], %12 {strides = array<i32>} : memref<16x128xf32, #tpu.memory_space<vmem>>, vector<16x128xf32>,
    } else {
    }
    %c0 = arith.constant 0 : index
    %c0_1 = arith.constant 0 : index
    %3 = vector.load %arg7[%c0, %c0_1] : memref<16x128xf32, #tpu.memory_space<vmem>>, vector<16x128xf32>
    %c0_2 = arith.constant 0 : index
    %c0_3 = arith.constant 0 : index
    %4 = vector.load %arg3[%c0_2, %c0_3] : memref<16x128xbf16, #tpu.memory_space<vmem>>, vector<16x128xbf16>
    %c0_4 = arith.constant 0 : index
    %c0_5 = arith.constant 0 : index
    %5 = vector.load %arg4[%c0_4, %c0_5] : memref<128x128xbf16, #tpu.memory_space<vmem>>, vector<128x128xbf16>
    %cst = arith.constant dense<0.000000e+00> : vector<16x128xf32>
    %6 = tpu.matmul %4, %5, %cst {dimension_numbers = #tpu.dot_dimension_numbers<[1], [0], [0], [1], [0, 0, 1, 1], [], []>} : vector<16x128xbf16>, vector<128x128xbf16>, vector<16x128xf32> -> vector<16x128xf32>
    %7 = arith.addf %3, %6 : vector<16x128xf32>
    %c0_6 = arith.constant 0 : index
    %c0_7 = arith.constant 0 : index
    %8 = vector.load %arg7[%c0_6, %c0_7] : memref<16x128xf32, #tpu.memory_space<vmem>>, vector<16x128xf32>
    tpu.vector_store %arg7[%c0_6, %c0_7], %7 {strides = array<i32>} : memref<16x128xf32, #tpu.memory_space<vmem>>, vector<16x128xf32>,
    %c0_i32_8 = arith.constant 0 : i32
    %9 = arith.cmpi eq, %arg2, %c0_i32_8 : i32
    %10 = arith.extui %9 : i1 to i32
    %c0_i32_9 = arith.constant 0 : i32
    %11 = arith.cmpi ne, %10, %c0_i32_9 : i32
    scf.if %11 {
      %c0_10 = arith.constant 0 : index
      %c0_11 = arith.constant 0 : index
      %12 = vector.load %arg7[%c0_10, %c0_11] : memref<16x128xf32, #tpu.memory_space<vmem>>, vector<16x128xf32>
      %c0_12 = arith.constant 0 : index
      %c0_13 = arith.constant 0 : index
      %13 = vector.load %arg5[%c0_12, %c0_13] : memref<1x128xf32, #tpu.memory_space<vmem>>, vector<1x128xf32>
      %14 = vector.broadcast %13 : vector<1x128xf32> to vector<16x128xf32>
      %15 = arith.addf %12, %14 : vector<16x128xf32>
      %16 = math.tanh %15 : vector<16x128xf32>
      %17 = arith.truncf %16 : vector<16x128xf32> to vector<16x128xbf16>
      %c0_14 = arith.constant 0 : index
      %c0_15 = arith.constant 0 : index
      %18 = vector.load %arg6[%c0_14, %c0_15] : memref<16x128xbf16, #tpu.memory_space<vmem>>, vector<16x128xbf16>
      tpu.vector_store %arg6[%c0_14, %c0_15], %17 {strides = array<i32>} : memref<16x128xbf16, #tpu.memory_space<vmem>>, vector<16x128xbf16>,
    } else {
    }
    return
  }
  func.func @transform_0(%arg0: i32, %arg1: i32, %arg2: i32) -> (i32, i32) {
    %c0_i32 = arith.constant 0 : i32
    return %arg0, %arg2 : i32, i32
  }
  func.func @transform_1(%arg0: i32, %arg1: i32, %arg2: i32) -> (i32, i32) {
    %c0_i32 = arith.constant 0 : i32
    return %arg2, %arg1 : i32, i32
  }
  func.func @transform_2(%arg0: i32, %arg1: i32, %arg2: i32) -> (i32, i32) {
    %c0_i32 = arith.constant 0 : i32
    %c0_i32_0 = arith.constant 0 : i32
    return %c0_i32, %arg1 : i32, i32
  }
  func.func @transform_3(%arg0: i32, %arg1: i32, %arg2: i32) -> (i32, i32) {
    %c0_i32 = arith.constant 0 : i32
    return %arg0, %arg1 : i32, i32
  }
}

</mosaic_0001>

<bundles_post_ra>
// kernel: tpu_custom_call.1
= control target key start
LH: loop header
LB: loop body
LE: loop exit
PB: predicated region body
PF: predicated region fallthrough
CT: control target
= control target key end

     0   :  { %8 = vsyncpa [#allocation4], 0  ;;  %s1063_s0 = inlined_call_operand.hbm [shape: bf16[32,128], index: 0, kind: input, shape index: {}]   ;;  %s1064_s1 = inlined_call_operand.hbm [shape: bf16[128,128], index: 1, kind: input, shape index: {}]   ;;  %s1065_s2 = inlined_call_operand.vmem [shape: f32[1,128], index: 2, kind: input, shape index: {}]   ;;  %s1066_s3 = inlined_call_operand.hbm [shape: bf16[32,128], index: 3, kind: output, shape index: {}]  }
   0x1   :  { %10 = vsyncpa [#allocation4 + $0x1], 0 }
   0x2   :  { %11 = vsyncpa [#allocation7], 0 }
   0x3   :  { %12 = vsyncpa [#allocation5], 0 }
   0x4   :  { %14 = vsyncpa [#allocation5 + $0x1], 0  ;;  %s866_s12 = smov 0   ;;  %s868_s13 = smov 0  }
   0x5   :  { %s870_s14 = smov 0   ;;  %s872_s15 = smov 0  }
   0x6   :  { %s874_s16 = smov 0   ;;  %s876_s17 = smov 0  }
   0x7 LB: > { %s537_s18 = sadd.s32 4294967295, %s835_s17   ;;  %s538_s19 = sadd.s32 4294967294, %s835_s17   ;;  %s835_s17 = sphi %s876_s17, %s20_s17   ;;  %s831_s16 = sphi %s874_s16, %s1088_s16   ;;  %s827_s15 = sphi %s872_s15, %s1087_s15   ;;  %s823_s14 = sphi %s870_s14, %s1086_s14   ;;  %s819_s13 = sphi %s868_s13, %s1085_s13   ;;  %s815_s12 = sphi %s866_s12, %s1084_s12  }
   0x8   : > { %p61_p0 = scmp.ne.s32.totalorder %s819_s13, %s815_s12  ;;  %p900_p1 = scmp.eq.s32.totalorder %s537_s18, 0 }
   0x9   : > { %p904_p2 = scmp.eq.s32.totalorder %s537_s18, 1  ;;  %p147_p3 = scmp.eq.s32.totalorder %s538_s19, 1 }
   0xa   : > { %p910_p4 = por %p900_p1, %p61_p0  ;;  %p539_p5 = scmp.ge.s32.totalorder %s835_s17, 1 }
   0xb   : > { %p915_p6 = por %p147_p3, %p61_p0  ;;  %p154_p7 = scmp.lt.s32.totalorder %s835_s17, 3 }
   0xc   : > { %s1072_s22 = scalar_select %p910_p4, 1, 0 }
   0xd   : > { %s1073_s23 = scalar_select %p915_p6, 1, 0 }
   0xe   : > { %p920_p8 = pnand %p539_p5, %p154_p7  ;;  %s837_s25 = smov [#allocation6]  }
   0xf   : > { %s170_s26 = sshll.u32 %s837_s25, 4  ;;  %s39_s28 = sadd.s32 1, %s831_s16  ;;  %s171_s26 = int_to_ptr.vmem [resolvable:$true] %s170_s26 }
  0x10   : > { %p613_p9 = pneg %p920_p8  ;;  %s708_s29 = scalar_lea.vmem %s171_s26, 1024 }
  0x11   : > { %p709_p13 = scmp.ne.s32.totalorder %s171_s26, %s708_s29  ;;  %p716_p5 = scmp.lt.s32.totalorder %s171_s26, %s171_s26 }
  0x12   : > { %p929_p11 = pnand %p613_p9, %p900_p1  ;;  %p717_p7 = scmp.lt.s32.totalorder %s708_s29, %s708_s29 }
  0x14   : > { %p699_p12 = pneg %p929_p11  ;;  %p718_p6 = por %p717_p7, %p716_p5 }
  0x16   : > { %p711_p0 = pnand %p709_p13, %p699_p12 }
  0x18   : > { %p712_p3 = pneg %p711_p0 }
  0x1a   : > { %p719_p4 = pnand %p718_p6, %p712_p3 }
  0x1c   : > { %722 = shalt.err (!%p719_p4)
}
  0x1d   : > { %s1068_s30 = smov 64   ;;  %s1069_s4 = smov 4  }
  0x1e   : > { %616 = dma.hbm_to_vmem [thread:$0]  (!%p929_p11), %s1064_s1, 1024, %s171_s26, [#allocation7], %s1068_s30, %s1068_s30, %s1069_s4  }
  0x1f   : > { %p41_p4 = scmp.ge.s32.totalorder %s39_s28, 2  ;;  %s48_s7 = sadd.s32 1, %s823_s14 }
  0x20   : > { %p55_p6 = scmp.ne.s32.totalorder %s823_s14, %s819_s13  ;;  %p56_p9 = scmp.eq.s32.totalorder %s835_s17, 0 }
  0x21   : > { %s1090_s28 = smov (%p41_p4, %s39_s28), 0  ;;  %p626_p0 = scmp.lt.s32.totalorder %s835_s17, 2 }
  0x22   : > { %p950_p12 = por %p56_p9, %p55_p6  ;;  %p956_p13 = por %p904_p2, %p55_p6 }
  0x23   : > { %s43_s10 = ssub.s32 %s831_s16, %s1090_s28  ;;  %s190_s11 = sand.u32 1, %s823_s14  }
  0x24   : > { %p46_p11 = scmp.eq.s32.totalorder %s43_s10, 0  ;;  %s543_s18 = sshll.u32 %s190_s11, 3 }
  0x25   : > { %s567_s25 = sshll.u32 %s831_s16, 7  ;;  %s194_s5 = scalar_lea.vmem [#allocation3], %s543_s18 }
  0x26   : > { %s965_s19 = scalar_select %p46_p11, %s823_s14, %s48_s7  }
  0x27   : > { %s201_s29 = scalar_lea.hbm %s1063_s0, %s567_s25  ;;  %s202_s6 = sshll.u32 %s194_s5, 4  ;;  %s203_s6 = int_to_ptr.vmem [resolvable:$true] %s202_s6 }
  0x28   : > { %p973_p2 = pnand %p626_p0, %p950_p12  ;;  %s191_s30 = scalar_lea.sflag [#allocation4], %s190_s11 }
  0x29   : > { %s736_s10 = scalar_lea.vmem %s203_s6, 128  ;;  %s840_s7 = smov [#allocation3]  }
  0x2a   : > { %p725_p3 = pneg %p973_p2  ;;  %p737_p5 = scmp.ne.s32.totalorder %s203_s6, %s736_s10 }
  0x2b   : > { %s741_s4 = sshll.u32 %s840_s7, 4  ;;  %s742_s4 = int_to_ptr.vmem [resolvable:$false] %s741_s4 }
  0x2c   : > { %p739_p7 = pnand %p737_p5, %p725_p3  ;;  %s743_s25 = scalar_lea.vmem %s742_s4, 256 }
  0x2d   : > { %p744_p6 = scmp.lt.s32.totalorder %s203_s6, %s742_s4  ;;  %p745_p9 = scmp.lt.s32.totalorder %s743_s25, %s736_s10 }
  0x2e   : > { %p740_p4 = pneg %p739_p7 }
  0x2f   : > { %p746_p11 = por %p745_p9, %p744_p6 }
  0x31   : > { %p747_p10 = pnand %p746_p11, %p740_p4 }
  0x33   : > { %750 = shalt.err (!%p747_p10)
}
  0x34   : > { %s1079_s8 = smov 4   ;;  %s1080_s18 = smov 64  }
  0x35   : > { %620 = dma.hbm_to_vmem [thread:$0]  (!%p973_p2), %s201_s29, 128, %s203_s6, %s191_s30, %s1080_s18, %s1080_s18, %s1079_s8  }
  0x36   : > { %214 = sbr.rel (%p920_p8) target bundleno = 324 (0x144), region = 32  ;;  %s987_s11 = sand.u32 (!%p920_p8), 1, %s819_s13  }
  0x37   : > { %s547_s4 = sshll.u32 (!%p920_p8), %s987_s11, 3  ;;  %s217_s26 = scalar_lea.sflag (!%p920_p8), [#allocation4], %s987_s11 }
  0x38   : > { %s993_s27 = scalar_lea.vmem (!%p920_p8), [#allocation3], %s547_s4  ;;  %p1081_p10 = scmp.ne.s32.totalorder (!%p920_p8), %s1072_s22, 0 }
  0x3b   : > { %802 = dma.done.wait (%p1081_p10), %s217_s26, 128  }
  0x3c   : > { %804 = vsyncadd (%p1081_p10), %s217_s26, 4294967168 }
  0x3d   : > { %806 = dma.done.wait (%p900_p1), [#allocation7], 1024  }
  0x3e   : > { %808 = vsyncadd (%p900_p1), [#allocation7], 4294966272  ;;  %v841_v0 = vmov 0.0   ;;  %vm842_vm0 = vmmov 0   ;;  %v684_v1 = vld [vmem:[#allocation6 + $0x38] sm:$0xff]   ;;  %v685_v2 = vld [vmem:[#allocation6 + $0x30] sm:$0xff]  }
  0x3f   : > { %585 = vmatprep.subr.bf16.mxu0 %v841_v0  ;;  %601 = vmatprep.mubr.msk.bf16.mxu0 %vm842_vm0, %v841_v0  ;;  %v686_v3 = vld [vmem:[#allocation6 + $0x28] sm:$0xff]   ;;  %v687_v4 = vld [vmem:[#allocation6 + $0x20] sm:$0xff]   ;;  %v688_v5 = vld [vmem:[#allocation6 + $0x18] sm:$0xff]   ;;  %s570_s24 = sshll.u32 %s827_s15, 7  ;;  %s249_s30 = scalar_lea.vmem [#allocation8], %s547_s4 }
  0x40   : > { %586 = vmatpush3.bf16.msra.mxu0 %v684_v1  ;;  %v689_v6 = vld [vmem:[#allocation6 + $0x10] sm:$0xff]   ;;  %v690_v7 = vld [vmem:[#allocation6 + $0x8] sm:$0xff]   ;;  %v691_v8 = vld [vmem:[#allocation6] sm:$0xff]   ;;  %s423_s29 = sshll.u32 %s249_s30, 4  ;;  %s1013_s21 = scalar_lea.hbm %s1066_s3, %s570_s24  ;;  %s1015_s29 = int_to_ptr.vmem [resolvable:$true] %s423_s29 }
  0x41   : > { %587 = vmatprep.subr.bf16.mxu0 %v841_v0  ;;  %v692_v9 = vld [vmem:[%s993_s27] sm:$0xff]   ;;  %s409_s10 = scalar_lea.sflag [#allocation5], %s987_s11  ;;  %s751_s7 = scalar_lea.vmem %s1015_s29, 128 }
  0x42   : > { %v559_v10 = vld [vmem:[%s1065_s2] ss:$0 sm:$0xff]  ;;  %p752_p1 = scmp.ne.s32.totalorder %s1015_s29, %s751_s7  ;;  %s843_s15 = smov [#allocation8]  }
  0x43   : > { %s755_s25 = sshll.u32 %s843_s15, 4  ;;  %s756_s25 = int_to_ptr.vmem [resolvable:$false] %s755_s25 }
  0x44   : > { %588 = vmatpush3.bf16.msra.mxu0 %v685_v2  ;;  %p753_p8 = pnand %p752_p1, %p956_p13  ;;  %s757_s8 = scalar_lea.vmem %s756_s25, 256 }
  0x45   : > { %589 = vmatprep.subr.bf16.mxu0 %v841_v0  ;;  %p758_p0 = scmp.lt.s32.totalorder %s1015_s29, %s756_s25  ;;  %p759_p2 = scmp.lt.s32.totalorder %s757_s8, %s751_s7 }
  0x46   : > { %p754_p12 = pneg %p753_p8 }
  0x47   : > { %p760_p3 = por %p759_p2, %p758_p0 }
  0x48   : > { %590 = vmatpush3.bf16.msra.mxu0 %v686_v3 }
  0x49   : > { %591 = vmatprep.subr.bf16.mxu0 %v841_v0  ;;  %p761_p5 = pnand %p760_p3, %p754_p12 }
  0x4c   : > { %592 = vmatpush3.bf16.msra.mxu0 %v687_v4 }
  0x4d   : > { %593 = vmatprep.subr.bf16.mxu0 %v841_v0 }
  0x50   : > { %594 = vmatpush3.bf16.msra.mxu0 %v688_v5 }
  0x51   : > { %595 = vmatprep.subr.bf16.mxu0 %v841_v0 }
  0x54   : > { %596 = vmatpush3.bf16.msra.mxu0 %v689_v6 }
  0x55   : > { %597 = vmatprep.subr.bf16.mxu0 %v841_v0 }
  0x58   : > { %598 = vmatpush3.bf16.msra.mxu0 %v690_v7 }
  0x59   : > { %599 = vmatprep.subr.bf16.mxu0 %v841_v0 }
  0x5c   : > { %600 = vmatpush3.bf16.msra.mxu0 %v691_v8 }
  0x5f   : > { %602 = vmatmul.mubr.bf16.vlgmr.msra.gmra.mxu0 %v692_v9 }
 0x11f   : > { %v371_v11 = vpop.f32.mrf.mxu0 }
 0x120   : > { %v394_v12 = vadd.f32 %v559_v10, %v371_v11 }
 0x121   : > { %v603_v13 = vpop.f32.mrf.mxu0 }
 0x122   : > { %693 = vtanh.f32 %v394_v12 }
 0x123   : > { %v374_v14 = vpop.f32.mrf.mxu0 }
 0x124   : > { %v395_v15 = vadd.f32 %v559_v10, %v374_v14 }
 0x125   : > { %v604_v16 = vpop.f32.mrf.mxu0 }
 0x126   : > { %695 = vtanh.f32 %v395_v15 }
 0x12f   : > { %v694_v17 = vpop.eup %693 }
 0x133   : > { %v696_v18 = vpop.eup %695 }
 0x134   : > { %v574_v19 = vpack.c.bf16 %v696_v18, %v694_v17 }
 0x136   : > { %575 = vst [vmem:[%s249_s30] sm:$0xff] %v574_v19  }
 0x137   : > { %764 = shalt.err (!%p761_p5)
}
 0x138   : > { %s765_s18 = scalar_lea.hbm %s1013_s21, 128  ;;  %s769_s27 = scalar_lea.hbm %s1066_s3, 256 }
 0x139   : > { %p766_p7 = scmp.ne.s32.totalorder %s1013_s21, %s765_s18  ;;  %p770_p9 = scmp.lt.s32.totalorder %s1013_s21, %s1066_s3 }
 0x13a   : > { %p771_p11 = scmp.lt.s32.totalorder %s769_s27, %s765_s18 }
 0x13b   : > { %p767_p4 = pnand %p766_p7, %p956_p13 }
 0x13c   : > { %p772_p10 = por %p771_p11, %p770_p9 }
 0x13d   : > { %p768_p6 = pneg %p767_p4 }
 0x13f   : > { %p773_p1 = pnand %p772_p10, %p768_p6 }
 0x141   : > { %776 = shalt.err (!%p773_p1)
}
 0x142   : > { %s844_s24 = smov 64   ;;  %s845_s30 = smov 4  }
 0x143   : > { %611 = dma.vmem_to_hbm [thread:$0]  (%p956_p13), %s1015_s29, 128, %s1013_s21, %s409_s10, %s844_s24, %s844_s24, %s845_s30  }
 0x144 PF: > { %s438_s5 = sand.u32 1, %s815_s12   ;;  %p1082_p8 = scmp.ne.s32.totalorder %s1073_s23, 0 }
 0x145   : > { %p1083_p12 = scmp.ge.s32.totalorder %s835_s17, 2  ;;  %s439_s6 = scalar_lea.sflag [#allocation5], %s438_s5 }
 0x147   : > { %p622_p0 = pnand %p1083_p12, %p1082_p8 }
 0x149   : > { %p623_p2 = pneg %p622_p0 }
 0x14b   : > { %810 = dma.done.wait (%p623_p2), %s439_s6, 128  }
 0x14c   : > { %812 = vsyncadd (%p623_p2), %s439_s6, 4294967168  ;;  %s20_s17 = sadd.s32 1, %s835_s17   ;;  %s1084_s12 = smov %s819_s13 }
 0x14d   : > { %p17_p3 = scmp.ge.s32.totalorder %s20_s17, 4   ;;  %s1085_s13 = smov %s823_s14 }
 0x14e   : > { %s1086_s14 = smov %s965_s19  ;;  %s1087_s15 = smov %s831_s16 }
 0x14f   : > { %s1088_s16 = smov %s1090_s28  ;;  %19 = sbr.rel (!%p17_p3) target bundleno = 7 (0x7), region = 93 }
 0x154   :  { %444 = vsyncpa [#allocation4], 1 }
 0x155   :  { %446 = vsyncpa [#allocation4 + $0x1], 1 }
 0x156   :  { %447 = vsyncpa [#allocation7], 1 }
 0x157   :  { %448 = vsyncpa [#allocation5], 1 }
 0x158   :  { %450 = vsyncpa [#allocation5 + $0x1], 1 }

</bundles_post_ra>
